<compile_context>
chip_gen: v6e
topology: v6e:2x2x1
jax: 0.10.0
libtpu: 0.0.40
codegen_flags: <defaults>
</compile_context>

<pallas_src>
import jax
import jax.numpy as jnp
from jax.experimental import pallas as pl
from jax.experimental.pallas import tpu as pltpu

HP = 128  # lane-dense padded hidden width (exact: all padding is zeros)


def _round_up(v, m):
    return ((v + m - 1) // m) * m


def _pad2(a, rows, cols):
    out = jnp.zeros((rows, cols), jnp.float32)
    return out.at[: a.shape[0], : a.shape[1]].set(a.astype(jnp.float32))


def _make_kernel(num_edges):
    """num_edges = number of REAL (unpadded) edges, static."""
    f32 = jnp.float32

    def kernel(
        src_ref, dst_ref,                 # SMEM scalar-prefetch: [E_pad] int32 each
        x_ref,                            # [N_pad, Din]   (pinned)
        ea_ref,                           # [TE, De]       (pipelined edge tile)
        batch_ref,                        # [1, N_pad] int32 (pinned)
        wmx_ref, wme_ref, bm_ref,         # MPL_1 params (padded to HP lanes)
        w1_ref, b1_ref, w2_ref, b2_ref, w3_ref, b3_ref,
        w4_ref, b4_ref, w5_ref, b5_ref,
        out_ref,                          # [G_pad, HP]
        xw_ref,                           # scratch [N_pad, HP]: x @ W_x
        h_ref,                            # scratch [N_pad, HP]: scatter-sum accum
        eaw_ref,                          # scratch [TE, HP]:   ea @ W_e + b (per tile)
    ):
        t = pl.program_id(0)
        te = eaw_ref.shape[0]
        g_pad = out_ref.shape[0]
        n_pad = h_ref.shape[0]

        # ---- once (first tile): per-node projection + zero the accumulator ----
        @pl.when(t == 0)
        def _init():
            xw_ref[...] = jnp.dot(x_ref[...], wmx_ref[...],
                                  preferred_element_type=f32)
            h_ref[...] = jnp.zeros_like(h_ref)

        # ---- per edge tile: vectorized edge branch on the MXU ----
        eaw_ref[...] = (
            jnp.dot(ea_ref[...], wme_ref[...], preferred_element_type=f32)
            + bm_ref[...]
        )

        base = t * te

        # ---- index-driven gather + ReLU message + scatter-add (O(E), no one-hot) ----
        def edge_body(i, carry):
            e = base + i
            s = src_ref[e]
            d = dst_ref[e]
            valid = (e < num_edges).astype(f32)   # mask padded edges
            msg = jnp.maximum(
                xw_ref[pl.ds(s, 1), :] + eaw_ref[pl.ds(i, 1), :], 0.0)
            h_ref[pl.ds(d, 1), :] = h_ref[pl.ds(d, 1), :] + msg * valid
            return carry

        jax.lax.fori_loop(0, te, edge_body, 0)

        # ---- last tile: node MLP, segment_coo(sum) pooling, graph MLP ----
        @pl.when(t == pl.num_programs(0) - 1)
        def _finalize():
            h = h_ref[...]
            h = jnp.maximum(
                jnp.dot(h, w1_ref[...], preferred_element_type=f32) + b1_ref[...], 0.0)
            h = jnp.maximum(
                jnp.dot(h, w2_ref[...], preferred_element_type=f32) + b2_ref[...], 0.0)
            h = jnp.maximum(
                jnp.dot(h, w3_ref[...], preferred_element_type=f32) + b3_ref[...], 0.0)

            # segment sum over batch index: tiny [G_pad, N_pad] selector built
            # in-kernel from the int32 batch vector (padded nodes -> id G_pad,
            # which matches no graph row).
            gid = jax.lax.broadcasted_iota(jnp.int32, (g_pad, n_pad), 0)
            pool = (gid == batch_ref[...]).astype(f32)            # [G_pad, N_pad]
            g = jnp.dot(pool, h, preferred_element_type=f32)      # [G_pad, HP]

            g = jnp.maximum(
                jnp.dot(g, w4_ref[...], preferred_element_type=f32) + b4_ref[...], 0.0)
            out_ref[...] = (
                jnp.dot(g, w5_ref[...], preferred_element_type=f32) + b5_ref[...])

    return kernel


def init_params(key, input_dimension, edge_dimension):
    ks = jax.random.split(key, 16)
    s = 0.1

    def w(k, shape):
        return (s * jax.random.normal(k, shape)).astype(jnp.float32)

    return dict(
        wmx=w(ks[0], (input_dimension, 10)),
        wme=w(ks[1], (edge_dimension, 10)),
        bm=w(ks[2], (1, 10)),
        w1=w(ks[3], (10, 10)), b1=w(ks[4], (1, 10)),
        w2=w(ks[5], (10, 10)), b2=w(ks[6], (1, 10)),
        w3=w(ks[7], (10, 5)),  b3=w(ks[8], (1, 5)),
        w4=w(ks[9], (5, 5)),   b4=w(ks[10], (1, 5)),
        w5=w(ks[11], (5, 1)),  b5=w(ks[12], (1, 1)),
    )


def model11_forward(edge_index, node_attr, edge_attr, batch, num_graphs, params,
                    *, edge_tile=128):
    f32 = jnp.float32
    N, Din = node_attr.shape
    E, De = edge_attr.shape
    G = int(num_graphs)

    # --- padding / layout glue (index setup only) ---
    N_pad = _round_up(max(N, 8), 8)
    G_pad = _round_up(max(G, 8), 8)
    TE = max(8, _round_up(min(edge_tile, E), 8))
    E_pad = _round_up(E, TE)
    n_tiles = E_pad // TE

    x_p = jnp.zeros((N_pad, Din), f32).at[:N, :].set(node_attr.astype(f32))
    ea_p = jnp.zeros((E_pad, De), f32).at[:E, :].set(edge_attr.astype(f32))
    src_p = jnp.zeros((E_pad,), jnp.int32).at[:E].set(edge_index[0].astype(jnp.int32))
    dst_p = jnp.zeros((E_pad,), jnp.int32).at[:E].set(edge_index[1].astype(jnp.int32))
    # Padded node rows get an out-of-range graph id -> excluded from pooling.
    batch_p = jnp.full((1, N_pad), G_pad, jnp.int32).at[0, :N].set(
        batch.astype(jnp.int32))

    # Zero-pad all weights/biases into one lane-dense 128-wide slab (exact).
    wmx = _pad2(params["wmx"], Din, HP)
    wme = _pad2(params["wme"], De, HP)
    bm = _pad2(params["bm"], 1, HP)
    w1 = _pad2(params["w1"], HP, HP); b1 = _pad2(params["b1"], 1, HP)
    w2 = _pad2(params["w2"], HP, HP); b2 = _pad2(params["b2"], 1, HP)
    w3 = _pad2(params["w3"], HP, HP); b3 = _pad2(params["b3"], 1, HP)
    w4 = _pad2(params["w4"], HP, HP); b4 = _pad2(params["b4"], 1, HP)
    w5 = _pad2(params["w5"], HP, HP); b5 = _pad2(params["b5"], 1, HP)

    def cspec(shape):
        return pl.BlockSpec(shape, lambda t, *_: (0, 0))

    in_specs = [
        cspec((N_pad, Din)),                               # x (pinned)
        pl.BlockSpec((TE, De), lambda t, *_: (t, 0)),      # edge_attr tile (pipelined)
        cspec((1, N_pad)),                                 # batch ids (pinned)
        cspec((Din, HP)), cspec((De, HP)), cspec((1, HP)), # MPL_1 params
        cspec((HP, HP)), cspec((1, HP)),                   # lin1
        cspec((HP, HP)), cspec((1, HP)),                   # lin2
        cspec((HP, HP)), cspec((1, HP)),                   # lin3
        cspec((HP, HP)), cspec((1, HP)),                   # lin4
        cspec((HP, HP)), cspec((1, HP)),                   # lin5
    ]

    scratch = [
        pltpu.VMEM((N_pad, HP), f32),   # xw = x @ W_x
        pltpu.VMEM((N_pad, HP), f32),   # node accumulator h
        pltpu.VMEM((TE, HP), f32),      # per-tile edge message precursor
    ]

    flops = (2 * N_pad * Din * HP + 2 * E_pad * De * HP + 4 * E_pad * HP
             + 3 * 2 * N_pad * HP * HP + 2 * G_pad * N_pad * HP
             + 2 * 2 * G_pad * HP * HP)
    bytes_accessed = 4 * (x_p.size + ea_p.size + batch_p.size + 2 * E_pad
                          + wmx.size + wme.size + bm.size
                          + 5 * HP * HP + 5 * HP + G_pad * HP)
    cost = pl.CostEstimate(flops=int(flops), transcendentals=0,
                           bytes_accessed=int(bytes_accessed))

    out_full = pl.pallas_call(
        _make_kernel(E),
        out_shape=jax.ShapeDtypeStruct((G_pad, HP), f32),
        grid_spec=pltpu.PrefetchScalarGridSpec(
            num_scalar_prefetch=2,
            grid=(n_tiles,),
            in_specs=in_specs,
            out_specs=pl.BlockSpec((G_pad, HP), lambda t, *_: (0, 0)),
            scratch_shapes=scratch,
        ),
        compiler_params=pltpu.CompilerParams(
            dimension_semantics=("arbitrary",)),
        cost_estimate=cost,
    )(src_p, dst_p,
      x_p, ea_p, batch_p,
      wmx, wme, bm, w1, b1, w2, b2, w3, b3, w4, b4, w5, b5)

    return out_full[:G, :1]


def model11_reference(edge_index, node_attr, edge_attr, batch, num_graphs, params):
    """Pure-JAX reference of the same forward pass (for a sanity check)."""
    x = node_attr.astype(jnp.float32)
    ea = edge_attr.astype(jnp.float32)
    src, dst = edge_index[0], edge_index[1]
    msg = jax.nn.relu(x[src] @ params["wmx"] + ea @ params["wme"] + params["bm"])
    h = jnp.zeros((x.shape[0], 10), jnp.float32).at[dst].add(msg)
    h = jax.nn.relu(h @ params["w1"] + params["b1"])
    h = jax.nn.relu(h @ params["w2"] + params["b2"])
    h = jax.nn.relu(h @ params["w3"] + params["b3"])
    g = jnp.zeros((num_graphs, 5), jnp.float32).at[batch].add(h)
    g = jax.nn.relu(g @ params["w4"] + params["b4"])
    return g @ params["w5"] + params["b5"]


if __name__ == "__main__":
    key = jax.random.PRNGKey(0)
    k_node, k_edge, k_ei, k_params = jax.random.split(key, 4)

    # Small synthetic graph batch: 2 graphs, 12 nodes, 24 edges.
    N, E, G = 12, 24, 2
    DIN, DE = 4, 3

    node_attr = jax.random.normal(k_node, (N, DIN), dtype=jnp.float32)
    edge_attr = jax.random.normal(k_edge, (E, DE), dtype=jnp.float32)
    # Edges within each graph's node range (graph 0: nodes 0..5, graph 1: 6..11).
    e0 = jax.random.randint(k_ei, (2, E // 2), 0, N // 2)
    e1 = jax.random.randint(jax.random.fold_in(k_ei, 1), (2, E // 2), 0, N // 2) + N // 2
    edge_index = jnp.concatenate([e0, e1], axis=1).astype(jnp.int32)     # [2, E]
    batch = jnp.concatenate(
        [jnp.zeros(N // 2, jnp.int32), jnp.ones(N // 2, jnp.int32)])     # [N]

    params = init_params(k_params, DIN, DE)

    # edge_tile=8 -> grid of 3 edge tiles (exercises init / accumulate / finalize).
    out = model11_forward(edge_index, node_attr, edge_attr, batch, G, params,
                          edge_tile=8)
    out = jax.block_until_ready(out)
    assert out.shape == (G, 1)

    with jax.default_matmul_precision("float32"):
        ref = model11_reference(edge_index, node_attr, edge_attr, batch, G, params)
    max_err = float(jnp.max(jnp.abs(out - ref)))
    assert max_err < 2e-2, f"kernel vs reference mismatch: max_err={max_err}"

    print("KERNEL_OK")
</pallas_src>

<mosaic_0001>
module attributes {stable_mosaic.version = 11 : i64} {
  func.func @kernel(%arg0: i32, %arg1: memref<24xi32, #tpu.memory_space<smem>>, %arg2: memref<24xi32, #tpu.memory_space<smem>>, %arg3: memref<16x4xf32, #tpu.memory_space<vmem>>, %arg4: memref<8x3xf32, #tpu.memory_space<vmem>>, %arg5: memref<1x16xi32, #tpu.memory_space<vmem>>, %arg6: memref<4x128xf32, #tpu.memory_space<vmem>>, %arg7: memref<3x128xf32, #tpu.memory_space<vmem>>, %arg8: memref<1x128xf32, #tpu.memory_space<vmem>>, %arg9: memref<128x128xf32, #tpu.memory_space<vmem>>, %arg10: memref<1x128xf32, #tpu.memory_space<vmem>>, %arg11: memref<128x128xf32, #tpu.memory_space<vmem>>, %arg12: memref<1x128xf32, #tpu.memory_space<vmem>>, %arg13: memref<128x128xf32, #tpu.memory_space<vmem>>, %arg14: memref<1x128xf32, #tpu.memory_space<vmem>>, %arg15: memref<128x128xf32, #tpu.memory_space<vmem>>, %arg16: memref<1x128xf32, #tpu.memory_space<vmem>>, %arg17: memref<128x128xf32, #tpu.memory_space<vmem>>, %arg18: memref<1x128xf32, #tpu.memory_space<vmem>>, %arg19: memref<8x128xf32, #tpu.memory_space<vmem>>, %arg20: memref<16x128xf32, #tpu.memory_space<vmem>>, %arg21: memref<16x128xf32, #tpu.memory_space<vmem>>, %arg22: memref<8x128xf32, #tpu.memory_space<vmem>>) attributes {dimension_semantics = [#tpu.dimension_semantics<arbitrary>], iteration_bounds = array<i64: 3>, scalar_prefetch = 2 : i64, scratch_operands = 3 : i64, tpu.core_type = #tpu.core_type<tc>, window_params = [{pipeline_mode = #tpu.pipeline_mode<synchronous>, transform_indices = @transform_0, window_bounds = array<i64: 16, 4>}, {transform_indices = @transform_1, window_bounds = array<i64: 8, 3>}, {pipeline_mode = #tpu.pipeline_mode<synchronous>, transform_indices = @transform_2, window_bounds = array<i64: 1, 16>}, {pipeline_mode = #tpu.pipeline_mode<synchronous>, transform_indices = @transform_3, window_bounds = array<i64: 4, 128>}, {pipeline_mode = #tpu.pipeline_mode<synchronous>, transform_indices = @transform_4, window_bounds = array<i64: 3, 128>}, {pipeline_mode = #tpu.pipeline_mode<synchronous>, transform_indices = @transform_5, window_bounds = array<i64: 1, 128>}, {pipeline_mode = #tpu.pipeline_mode<synchronous>, transform_indices = @transform_6, window_bounds = array<i64: 128, 128>}, {pipeline_mode = #tpu.pipeline_mode<synchronous>, transform_indices = @transform_7, window_bounds = array<i64: 1, 128>}, {pipeline_mode = #tpu.pipeline_mode<synchronous>, transform_indices = @transform_8, window_bounds = array<i64: 128, 128>}, {pipeline_mode = #tpu.pipeline_mode<synchronous>, transform_indices = @transform_9, window_bounds = array<i64: 1, 128>}, {pipeline_mode = #tpu.pipeline_mode<synchronous>, transform_indices = @transform_10, window_bounds = array<i64: 128, 128>}, {pipeline_mode = #tpu.pipeline_mode<synchronous>, transform_indices = @transform_11, window_bounds = array<i64: 1, 128>}, {pipeline_mode = #tpu.pipeline_mode<synchronous>, transform_indices = @transform_12, window_bounds = array<i64: 128, 128>}, {pipeline_mode = #tpu.pipeline_mode<synchronous>, transform_indices = @transform_13, window_bounds = array<i64: 1, 128>}, {pipeline_mode = #tpu.pipeline_mode<synchronous>, transform_indices = @transform_14, window_bounds = array<i64: 128, 128>}, {pipeline_mode = #tpu.pipeline_mode<synchronous>, transform_indices = @transform_15, window_bounds = array<i64: 1, 128>}, {pipeline_mode = #tpu.pipeline_mode<synchronous>, transform_indices = @transform_16, window_bounds = array<i64: 8, 128>}]} {
    %c0_i32 = arith.constant 0 : i32
    %0 = arith.cmpi eq, %arg0, %c0_i32 : i32
    %1 = arith.extui %0 : i1 to i32
    %c0_i32_0 = arith.constant 0 : i32
    %2 = arith.cmpi ne, %1, %c0_i32_0 : i32
    scf.if %2 {
      %c0_12 = arith.constant 0 : index
      %c0_13 = arith.constant 0 : index
      %15 = vector.load %arg3[%c0_12, %c0_13] : memref<16x4xf32, #tpu.memory_space<vmem>>, vector<16x4xf32>
      %c0_14 = arith.constant 0 : index
      %c0_15 = arith.constant 0 : index
      %16 = vector.load %arg6[%c0_14, %c0_15] : memref<4x128xf32, #tpu.memory_space<vmem>>, vector<4x128xf32>
      %cst_16 = arith.constant dense<0.000000e+00> : vector<16x128xf32>
      %17 = tpu.matmul %15, %16, %cst_16 {dimension_numbers = #tpu.dot_dimension_numbers<[1], [0], [0], [1], [0, 0, 1, 1], [], []>} : vector<16x4xf32>, vector<4x128xf32>, vector<16x128xf32> -> vector<16x128xf32>
      %c0_17 = arith.constant 0 : index
      %c0_18 = arith.constant 0 : index
      %18 = vector.load %arg20[%c0_17, %c0_18] : memref<16x128xf32, #tpu.memory_space<vmem>>, vector<16x128xf32>
      tpu.vector_store %arg20[%c0_17, %c0_18], %17 {strides = array<i32>} : memref<16x128xf32, #tpu.memory_space<vmem>>, vector<16x128xf32>,
      %cst_19 = arith.constant 0.000000e+00 : f32
      %19 = vector.broadcast %cst_19 : f32 to vector<16x128xf32>
      %c0_20 = arith.constant 0 : index
      %c0_21 = arith.constant 0 : index
      %20 = vector.load %arg21[%c0_20, %c0_21] : memref<16x128xf32, #tpu.memory_space<vmem>>, vector<16x128xf32>
      tpu.vector_store %arg21[%c0_20, %c0_21], %19 {strides = array<i32>} : memref<16x128xf32, #tpu.memory_space<vmem>>, vector<16x128xf32>,
    } else {
    }
    %c0 = arith.constant 0 : index
    %c0_1 = arith.constant 0 : index
    %3 = vector.load %arg4[%c0, %c0_1] : memref<8x3xf32, #tpu.memory_space<vmem>>, vector<8x3xf32>
    %c0_2 = arith.constant 0 : index
    %c0_3 = arith.constant 0 : index
    %4 = vector.load %arg7[%c0_2, %c0_3] : memref<3x128xf32, #tpu.memory_space<vmem>>, vector<3x128xf32>
    %cst = arith.constant dense<0.000000e+00> : vector<8x128xf32>
    %5 = tpu.matmul %3, %4, %cst {dimension_numbers = #tpu.dot_dimension_numbers<[1], [0], [0], [1], [0, 0, 1, 1], [], []>} : vector<8x3xf32>, vector<3x128xf32>, vector<8x128xf32> -> vector<8x128xf32>
    %c0_4 = arith.constant 0 : index
    %c0_5 = arith.constant 0 : index
    %6 = vector.load %arg8[%c0_4, %c0_5] : memref<1x128xf32, #tpu.memory_space<vmem>>, vector<1x128xf32>
    %7 = vector.broadcast %6 : vector<1x128xf32> to vector<8x128xf32>
    %8 = arith.addf %5, %7 : vector<8x128xf32>
    %c0_6 = arith.constant 0 : index
    %c0_7 = arith.constant 0 : index
    %9 = vector.load %arg22[%c0_6, %c0_7] : memref<8x128xf32, #tpu.memory_space<vmem>>, vector<8x128xf32>
    tpu.vector_store %arg22[%c0_6, %c0_7], %8 {strides = array<i32>} : memref<8x128xf32, #tpu.memory_space<vmem>>, vector<8x128xf32>,
    %c8_i32 = arith.constant 8 : i32
    %10 = arith.muli %arg0, %c8_i32 : i32
    %c0_i32_8 = arith.constant 0 : i32
    %c8_i32_9 = arith.constant 8 : i32
    %11 = arith.addi %c0_i32_8, %c8_i32_9 : i32
    %c1_i32 = arith.constant 1 : i32
    scf.for %arg23 = %c0_i32_8 to %11 step %c1_i32  : i32 {
      %15 = arith.addi %10, %arg23 : i32
      %16 = arith.index_cast %15 : i32 to index
      %17 = memref.load %arg1[%16] : memref<24xi32, #tpu.memory_space<smem>>
      %18 = arith.index_cast %15 : i32 to index
      %19 = memref.load %arg2[%18] : memref<24xi32, #tpu.memory_space<smem>>
      %c24_i32 = arith.constant 24 : i32
      %20 = arith.cmpi slt, %15, %c24_i32 : i32
      %21 = arith.extui %20 : i1 to i32
      %22 = arith.sitofp %21 : i32 to f32
      %23 = arith.index_cast %17 : i32 to index
      %c0_12 = arith.constant 0 : index
      %24 = vector.load %arg20[%23, %c0_12] : memref<16x128xf32, #tpu.memory_space<vmem>>, vector<1x128xf32>
      %25 = arith.index_cast %arg23 : i32 to index
      %c0_13 = arith.constant 0 : index
      %26 = vector.load %arg22[%25, %c0_13] : memref<8x128xf32, #tpu.memory_space<vmem>>, vector<1x128xf32>
      %27 = arith.addf %24, %26 : vector<1x128xf32>
      %cst_14 = arith.constant 0.000000e+00 : f32
      %28 = vector.broadcast %cst_14 : f32 to vector<1x128xf32>
      %29 = arith.maximumf %27, %28 : vector<1x128xf32>
      %30 = arith.index_cast %19 : i32 to index
      %c0_15 = arith.constant 0 : index
      %31 = vector.load %arg21[%30, %c0_15] : memref<16x128xf32, #tpu.memory_space<vmem>>, vector<1x128xf32>
      %32 = vector.broadcast %22 : f32 to vector<1x128xf32>
      %33 = arith.mulf %29, %32 : vector<1x128xf32>
      %34 = arith.addf %31, %33 : vector<1x128xf32>
      %35 = arith.index_cast %19 : i32 to index
      %c0_16 = arith.constant 0 : index
      %36 = vector.load %arg21[%35, %c0_16] : memref<16x128xf32, #tpu.memory_space<vmem>>, vector<1x128xf32>
      tpu.vector_store %arg21[%35, %c0_16], %34 {strides = array<i32>} : memref<16x128xf32, #tpu.memory_space<vmem>>, vector<1x128xf32>,
    }
    %c8_i32_10 = arith.constant 8 : i32
    %c2_i32 = arith.constant 2 : i32
    %12 = arith.cmpi eq, %arg0, %c2_i32 : i32
    %13 = arith.extui %12 : i1 to i32
    %c0_i32_11 = arith.constant 0 : i32
    %14 = arith.cmpi ne, %13, %c0_i32_11 : i32
    scf.if %14 {
      %c0_12 = arith.constant 0 : index
      %c0_13 = arith.constant 0 : index
      %15 = vector.load %arg21[%c0_12, %c0_13] : memref<16x128xf32, #tpu.memory_space<vmem>>, vector<16x128xf32>
      %c0_14 = arith.constant 0 : index
      %c0_15 = arith.constant 0 : index
      %16 = vector.load %arg9[%c0_14, %c0_15] : memref<128x128xf32, #tpu.memory_space<vmem>>, vector<128x128xf32>
      %cst_16 = arith.constant dense<0.000000e+00> : vector<16x128xf32>
      %17 = tpu.matmul %15, %16, %cst_16 {dimension_numbers = #tpu.dot_dimension_numbers<[1], [0], [0], [1], [0, 0, 1, 1], [], []>} : vector<16x128xf32>, vector<128x128xf32>, vector<16x128xf32> -> vector<16x128xf32>
      %c0_17 = arith.constant 0 : index
      %c0_18 = arith.constant 0 : index
      %18 = vector.load %arg10[%c0_17, %c0_18] : memref<1x128xf32, #tpu.memory_space<vmem>>, vector<1x128xf32>
      %19 = vector.broadcast %18 : vector<1x128xf32> to vector<16x128xf32>
      %20 = arith.addf %17, %19 : vector<16x128xf32>
      %cst_19 = arith.constant 0.000000e+00 : f32
      %21 = vector.broadcast %cst_19 : f32 to vector<16x128xf32>
      %22 = arith.maximumf %20, %21 : vector<16x128xf32>
      %c0_20 = arith.constant 0 : index
      %c0_21 = arith.constant 0 : index
      %23 = vector.load %arg11[%c0_20, %c0_21] : memref<128x128xf32, #tpu.memory_space<vmem>>, vector<128x128xf32>
      %cst_22 = arith.constant dense<0.000000e+00> : vector<16x128xf32>
      %24 = tpu.matmul %22, %23, %cst_22 {dimension_numbers = #tpu.dot_dimension_numbers<[1], [0], [0], [1], [0, 0, 1, 1], [], []>} : vector<16x128xf32>, vector<128x128xf32>, vector<16x128xf32> -> vector<16x128xf32>
      %c0_23 = arith.constant 0 : index
      %c0_24 = arith.constant 0 : index
      %25 = vector.load %arg12[%c0_23, %c0_24] : memref<1x128xf32, #tpu.memory_space<vmem>>, vector<1x128xf32>
      %26 = vector.broadcast %25 : vector<1x128xf32> to vector<16x128xf32>
      %27 = arith.addf %24, %26 : vector<16x128xf32>
      %cst_25 = arith.constant 0.000000e+00 : f32
      %28 = vector.broadcast %cst_25 : f32 to vector<16x128xf32>
      %29 = arith.maximumf %27, %28 : vector<16x128xf32>
      %c0_26 = arith.constant 0 : index
      %c0_27 = arith.constant 0 : index
      %30 = vector.load %arg13[%c0_26, %c0_27] : memref<128x128xf32, #tpu.memory_space<vmem>>, vector<128x128xf32>
      %cst_28 = arith.constant dense<0.000000e+00> : vector<16x128xf32>
      %31 = tpu.matmul %29, %30, %cst_28 {dimension_numbers = #tpu.dot_dimension_numbers<[1], [0], [0], [1], [0, 0, 1, 1], [], []>} : vector<16x128xf32>, vector<128x128xf32>, vector<16x128xf32> -> vector<16x128xf32>
      %c0_29 = arith.constant 0 : index
      %c0_30 = arith.constant 0 : index
      %32 = vector.load %arg14[%c0_29, %c0_30] : memref<1x128xf32, #tpu.memory_space<vmem>>, vector<1x128xf32>
      %33 = vector.broadcast %32 : vector<1x128xf32> to vector<16x128xf32>
      %34 = arith.addf %31, %33 : vector<16x128xf32>
      %cst_31 = arith.constant 0.000000e+00 : f32
      %35 = vector.broadcast %cst_31 : f32 to vector<16x128xf32>
      %36 = arith.maximumf %34, %35 : vector<16x128xf32>
      %37 = tpu.iota {dimensions = array<i32: 0>} : vector<8x16xi32>
      %c0_32 = arith.constant 0 : index
      %c0_33 = arith.constant 0 : index
      %38 = vector.load %arg5[%c0_32, %c0_33] : memref<1x16xi32, #tpu.memory_space<vmem>>, vector<1x16xi32>
      %39 = vector.broadcast %38 : vector<1x16xi32> to vector<8x16xi32>
      %40 = arith.cmpi eq, %37, %39 : vector<8x16xi32>
      %41 = arith.extui %40 : vector<8x16xi1> to vector<8x16xi32>
      %42 = arith.sitofp %41 : vector<8x16xi32> to vector<8x16xf32>
      %cst_34 = arith.constant dense<0.000000e+00> : vector<8x128xf32>
      %43 = tpu.matmul %42, %36, %cst_34 {dimension_numbers = #tpu.dot_dimension_numbers<[1], [0], [0], [1], [0, 0, 1, 1], [], []>} : vector<8x16xf32>, vector<16x128xf32>, vector<8x128xf32> -> vector<8x128xf32>
      %c0_35 = arith.constant 0 : index
      %c0_36 = arith.constant 0 : index
      %44 = vector.load %arg15[%c0_35, %c0_36] : memref<128x128xf32, #tpu.memory_space<vmem>>, vector<128x128xf32>
      %cst_37 = arith.constant dense<0.000000e+00> : vector<8x128xf32>
      %45 = tpu.matmul %43, %44, %cst_37 {dimension_numbers = #tpu.dot_dimension_numbers<[1], [0], [0], [1], [0, 0, 1, 1], [], []>} : vector<8x128xf32>, vector<128x128xf32>, vector<8x128xf32> -> vector<8x128xf32>
      %c0_38 = arith.constant 0 : index
      %c0_39 = arith.constant 0 : index
      %46 = vector.load %arg16[%c0_38, %c0_39] : memref<1x128xf32, #tpu.memory_space<vmem>>, vector<1x128xf32>
      %47 = vector.broadcast %46 : vector<1x128xf32> to vector<8x128xf32>
      %48 = arith.addf %45, %47 : vector<8x128xf32>
      %cst_40 = arith.constant 0.000000e+00 : f32
      %49 = vector.broadcast %cst_40 : f32 to vector<8x128xf32>
      %50 = arith.maximumf %48, %49 : vector<8x128xf32>
      %c0_41 = arith.constant 0 : index
      %c0_42 = arith.constant 0 : index
      %51 = vector.load %arg17[%c0_41, %c0_42] : memref<128x128xf32, #tpu.memory_space<vmem>>, vector<128x128xf32>
      %cst_43 = arith.constant dense<0.000000e+00> : vector<8x128xf32>
      %52 = tpu.matmul %50, %51, %cst_43 {dimension_numbers = #tpu.dot_dimension_numbers<[1], [0], [0], [1], [0, 0, 1, 1], [], []>} : vector<8x128xf32>, vector<128x128xf32>, vector<8x128xf32> -> vector<8x128xf32>
      %c0_44 = arith.constant 0 : index
      %c0_45 = arith.constant 0 : index
      %53 = vector.load %arg18[%c0_44, %c0_45] : memref<1x128xf32, #tpu.memory_space<vmem>>, vector<1x128xf32>
      %54 = vector.broadcast %53 : vector<1x128xf32> to vector<8x128xf32>
      %55 = arith.addf %52, %54 : vector<8x128xf32>
      %c0_46 = arith.constant 0 : index
      %c0_47 = arith.constant 0 : index
      %56 = vector.load %arg19[%c0_46, %c0_47] : memref<8x128xf32, #tpu.memory_space<vmem>>, vector<8x128xf32>
      tpu.vector_store %arg19[%c0_46, %c0_47], %55 {strides = array<i32>} : memref<8x128xf32, #tpu.memory_space<vmem>>, vector<8x128xf32>,
    } else {
    }
    return
  }
  func.func @transform_0(%arg0: i32, %arg1: memref<24xi32, #tpu.memory_space<smem>>, %arg2: memref<24xi32, #tpu.memory_space<smem>>) -> (i32, i32) {
    %c0_i32 = arith.constant 0 : i32
    %c0_i32_0 = arith.constant 0 : i32
    %c0_i32_1 = arith.constant 0 : i32
    return %c0_i32, %c0_i32_0 : i32, i32
  }
  func.func @transform_1(%arg0: i32, %arg1: memref<24xi32, #tpu.memory_space<smem>>, %arg2: memref<24xi32, #tpu.memory_space<smem>>) -> (i32, i32) {
    %c0_i32 = arith.constant 0 : i32
    %c0_i32_0 = arith.constant 0 : i32
    return %arg0, %c0_i32 : i32, i32
  }
  func.func @transform_2(%arg0: i32, %arg1: memref<24xi32, #tpu.memory_space<smem>>, %arg2: memref<24xi32, #tpu.memory_space<smem>>) -> (i32, i32) {
    %c0_i32 = arith.constant 0 : i32
    %c0_i32_0 = arith.constant 0 : i32
    %c0_i32_1 = arith.constant 0 : i32
    return %c0_i32, %c0_i32_0 : i32, i32
  }
  func.func @transform_3(%arg0: i32, %arg1: memref<24xi32, #tpu.memory_space<smem>>, %arg2: memref<24xi32, #tpu.memory_space<smem>>) -> (i32, i32) {
    %c0_i32 = arith.constant 0 : i32
    %c0_i32_0 = arith.constant 0 : i32
    %c0_i32_1 = arith.constant 0 : i32
    return %c0_i32, %c0_i32_0 : i32, i32
  }
  func.func @transform_4(%arg0: i32, %arg1: memref<24xi32, #tpu.memory_space<smem>>, %arg2: memref<24xi32, #tpu.memory_space<smem>>) -> (i32, i32) {
    %c0_i32 = arith.constant 0 : i32
    %c0_i32_0 = arith.constant 0 : i32
    %c0_i32_1 = arith.constant 0 : i32
    return %c0_i32, %c0_i32_0 : i32, i32
  }
  func.func @transform_5(%arg0: i32, %arg1: memref<24xi32, #tpu.memory_space<smem>>, %arg2: memref<24xi32, #tpu.memory_space<smem>>) -> (i32, i32) {
    %c0_i32 = arith.constant 0 : i32
    %c0_i32_0 = arith.constant 0 : i32
    %c0_i32_1 = arith.constant 0 : i32
    return %c0_i32, %c0_i32_0 : i32, i32
  }
  func.func @transform_6(%arg0: i32, %arg1: memref<24xi32, #tpu.memory_space<smem>>, %arg2: memref<24xi32, #tpu.memory_space<smem>>) -> (i32, i32) {
    %c0_i32 = arith.constant 0 : i32
    %c0_i32_0 = arith.constant 0 : i32
    %c0_i32_1 = arith.constant 0 : i32
    return %c0_i32, %c0_i32_0 : i32, i32
  }
  func.func @transform_7(%arg0: i32, %arg1: memref<24xi32, #tpu.memory_space<smem>>, %arg2: memref<24xi32, #tpu.memory_space<smem>>) -> (i32, i32) {
    %c0_i32 = arith.constant 0 : i32
    %c0_i32_0 = arith.constant 0 : i32
    %c0_i32_1 = arith.constant 0 : i32
    return %c0_i32, %c0_i32_0 : i32, i32
  }
  func.func @transform_8(%arg0: i32, %arg1: memref<24xi32, #tpu.memory_space<smem>>, %arg2: memref<24xi32, #tpu.memory_space<smem>>) -> (i32, i32) {
    %c0_i32 = arith.constant 0 : i32
    %c0_i32_0 = arith.constant 0 : i32
    %c0_i32_1 = arith.constant 0 : i32
    return %c0_i32, %c0_i32_0 : i32, i32
  }
  func.func @transform_9(%arg0: i32, %arg1: memref<24xi32, #tpu.memory_space<smem>>, %arg2: memref<24xi32, #tpu.memory_space<smem>>) -> (i32, i32) {
    %c0_i32 = arith.constant 0 : i32
    %c0_i32_0 = arith.constant 0 : i32
    %c0_i32_1 = arith.constant 0 : i32
    return %c0_i32, %c0_i32_0 : i32, i32
  }
  func.func @transform_10(%arg0: i32, %arg1: memref<24xi32, #tpu.memory_space<smem>>, %arg2: memref<24xi32, #tpu.memory_space<smem>>) -> (i32, i32) {
    %c0_i32 = arith.constant 0 : i32
    %c0_i32_0 = arith.constant 0 : i32
    %c0_i32_1 = arith.constant 0 : i32
    return %c0_i32, %c0_i32_0 : i32, i32
  }
  func.func @transform_11(%arg0: i32, %arg1: memref<24xi32, #tpu.memory_space<smem>>, %arg2: memref<24xi32, #tpu.memory_space<smem>>) -> (i32, i32) {
    %c0_i32 = arith.constant 0 : i32
    %c0_i32_0 = arith.constant 0 : i32
    %c0_i32_1 = arith.constant 0 : i32
    return %c0_i32, %c0_i32_0 : i32, i32
  }
  func.func @transform_12(%arg0: i32, %arg1: memref<24xi32, #tpu.memory_space<smem>>, %arg2: memref<24xi32, #tpu.memory_space<smem>>) -> (i32, i32) {
    %c0_i32 = arith.constant 0 : i32
    %c0_i32_0 = arith.constant 0 : i32
    %c0_i32_1 = arith.constant 0 : i32
    return %c0_i32, %c0_i32_0 : i32, i32
  }
  func.func @transform_13(%arg0: i32, %arg1: memref<24xi32, #tpu.memory_space<smem>>, %arg2: memref<24xi32, #tpu.memory_space<smem>>) -> (i32, i32) {
    %c0_i32 = arith.constant 0 : i32
    %c0_i32_0 = arith.constant 0 : i32
    %c0_i32_1 = arith.constant 0 : i32
    return %c0_i32, %c0_i32_0 : i32, i32
  }
  func.func @transform_14(%arg0: i32, %arg1: memref<24xi32, #tpu.memory_space<smem>>, %arg2: memref<24xi32, #tpu.memory_space<smem>>) -> (i32, i32) {
    %c0_i32 = arith.constant 0 : i32
    %c0_i32_0 = arith.constant 0 : i32
    %c0_i32_1 = arith.constant 0 : i32
    return %c0_i32, %c0_i32_0 : i32, i32
  }
  func.func @transform_15(%arg0: i32, %arg1: memref<24xi32, #tpu.memory_space<smem>>, %arg2: memref<24xi32, #tpu.memory_space<smem>>) -> (i32, i32) {
    %c0_i32 = arith.constant 0 : i32
    %c0_i32_0 = arith.constant 0 : i32
    %c0_i32_1 = arith.constant 0 : i32
    return %c0_i32, %c0_i32_0 : i32, i32
  }
  func.func @transform_16(%arg0: i32, %arg1: memref<24xi32, #tpu.memory_space<smem>>, %arg2: memref<24xi32, #tpu.memory_space<smem>>) -> (i32, i32) {
    %c0_i32 = arith.constant 0 : i32
    %c0_i32_0 = arith.constant 0 : i32
    %c0_i32_1 = arith.constant 0 : i32
    return %c0_i32, %c0_i32_0 : i32, i32
  }
}

</mosaic_0001>

<bundles_post_ra>
// kernel: tpu_custom_call.1
= control target key start
LH: loop header
LB: loop body
LE: loop exit
PB: predicated region body
PF: predicated region fallthrough
CT: control target
= control target key end

     0   :  { %s2428_s0 = inlined_call_operand.vmem [shape: s32[24], index: 0, kind: input, shape index: {}]   ;;  %s2429_s2 = inlined_call_operand.vmem [shape: f32[16,4], index: 2, kind: input, shape index: {}]   ;;  %s2430_s3 = inlined_call_operand.vmem [shape: f32[24,3], index: 3, kind: input, shape index: {}]   ;;  %s2431_s4 = inlined_call_operand.vmem [shape: s32[1,16], index: 4, kind: input, shape index: {}]   ;;  %s2432_s5 = inlined_call_operand.vmem [shape: f32[4,128], index: 5, kind: input, shape index: {}]   ;;  %s2433_s6 = inlined_call_operand.vmem [shape: f32[3,128], index: 6, kind: input, shape index: {}]   ;;  %s2434_s7 = inlined_call_operand.vmem [shape: f32[1,128], index: 7, kind: input, shape index: {}]   ;;  %s2435_s8 = inlined_call_operand.hbm [shape: f32[128,128], index: 8, kind: input, shape index: {}]   ;;  %s2436_s9 = inlined_call_operand.vmem [shape: f32[1,128], index: 9, kind: input, shape index: {}]   ;;  %s2437_s10 = inlined_call_operand.hbm [shape: f32[128,128], index: 10, kind: input, shape index: {}]   ;;  %s2438_s11 = inlined_call_operand.vmem [shape: f32[1,128], index: 11, kind: input, shape index: {}]   ;;  %s2439_s12 = inlined_call_operand.hbm [shape: f32[128,128], index: 12, kind: input, shape index: {}]   ;;  %s2440_s13 = inlined_call_operand.vmem [shape: f32[1,128], index: 13, kind: input, shape index: {}]   ;;  %s2441_s14 = inlined_call_operand.hbm [shape: f32[128,128], index: 14, kind: input, shape index: {}]   ;;  %s2442_s15 = inlined_call_operand.vmem [shape: f32[1,128], index: 15, kind: input, shape index: {}]   ;;  %s2443_s16 = inlined_call_operand.hbm [shape: f32[128,128], index: 16, kind: input, shape index: {}]   ;;  %s2444_s17 = inlined_call_operand.vmem [shape: f32[1,128], index: 17, kind: input, shape index: {}]   ;;  %s2445_s18 = inlined_call_operand.hbm [shape: f32[8,128], index: 18, kind: output, shape index: {}]   ;;  %s2446_s1 = inlined_call_operand.vmem [shape: s32[24], index: 1, kind: input, shape index: {}]  }
   0x1   :  { %2448 = sst [smem:[#allocation23_spill]] %s2428_s0  ;;  %s27_s19 = sshll.u32 %s2446_s1, 4  ;;  %s28_s19 = int_to_ptr.vmem [resolvable:$true] %s27_s19 }
   0x2   :  { %2449 = sst [smem:[#allocation24_spill]] %s2429_s2 }
   0x3   :  { %2450 = sst [smem:[#allocation25_spill]] %s2430_s3 }
   0x4   :  { %2451 = sst [smem:[#allocation26_spill]] %s2431_s4 }
   0x5   :  { %s2452_s29 = sld [smem:[#allocation23_spill]] }
   0xb   :  { %s23_s4 = sshll.u32 %s2452_s29, 4  ;;  %s24_s4 = int_to_ptr.vmem [resolvable:$true] %s23_s4 }
   0xc   :  { %s1889_s2 = scalar_lea.vmem %s24_s4, 16  ;;  %p1894_p1 = scmp.lt.s32.totalorder %s24_s4, %s24_s4 }
   0xd   :  { %p1890_p0 = scmp.ne.s32.totalorder %s24_s4, %s1889_s2  ;;  %p1895_p2 = scmp.lt.s32.totalorder %s1889_s2, %s1889_s2 }
   0xf   :  { %p1896_p3 = por %p1895_p2, %p1894_p1 }
  0x11   :  { %p1897_p4 = pnand %p1896_p3, %p1890_p0 }
  0x13   :  { %1900 = shalt.err (!%p1897_p4)  }
  0x14   :  { %s2101_s20 = smov [#allocation6]   ;;  %s1901_s21 = scalar_lea.vmem %s28_s19, 16 }
  0x15   :  { %26 = dma.vmem_to_smem %s24_s4, 16, %s2101_s20, [#allocation5] }
  0x16   :  { %p1902_p5 = scmp.ne.s32.totalorder %s28_s19, %s1901_s21  ;;  %p1906_p6 = scmp.lt.s32.totalorder %s28_s19, %s28_s19 }
  0x17   :  { %p1907_p7 = scmp.lt.s32.totalorder %s1901_s21, %s1901_s21 }
  0x19   :  { %p1908_p8 = por %p1907_p7, %p1906_p6 }
  0x1b   :  { %p1909_p9 = pnand %p1908_p8, %p1902_p5 }
  0x1d   :  { %1912 = shalt.err (!%p1909_p9)  }
  0x1e   :  { %s2102_s22 = smov [#allocation7]  }
  0x1f   :  { %30 = dma.vmem_to_smem %s28_s19, 16, %s2102_s22, [#allocation5] }
  0x20   :  { %2075 = dma.done.wait [#allocation5], 32 }
  0x21   :  { %2076 = vsyncadd [#allocation5], 4294967264 }
  0x22   :  { %32 = sfence }
  0x23   :  { %33 = vsyncpa [#allocation9], 0 }
  0x24   :  { %34 = vsyncpa [#allocation12], 0 }
  0x25   :  { %35 = vsyncpa [#allocation15], 0 }
  0x26   :  { %36 = vsyncpa [#allocation10], 0  ;;  %s2217_s1 = smov 0  }
  0x27 LB: > { %s2223_s4 = sadd.s32 4294967295, %s2095_s1   ;;  %p1483_p10 = scmp.ge.s32.totalorder %s2095_s1, 1  ;;  %s2095_s1 = sphi %s2217_s1, %s42_s1  }
  0x28   : > { %p409_p11 = scmp.lt.s32.totalorder %s2095_s1, 4  ;;  %p1484_p12 = scmp.ne.s32.totalorder %s2223_s4, 0 }
  0x29   : > { %p1846_p13 = scmp.eq.s32.totalorder %s2223_s4, 0  ;;  %s2103_s23 = smov [#allocation11]  }
  0x2a   : > { %p2229_p0 = pnand %p1483_p10, %p409_p11  ;;  %s452_s24 = sshll.u32 %s2103_s23, 4  ;;  %s453_s24 = int_to_ptr.vmem [resolvable:$true] %s452_s24 }
  0x2b   : > { %s2104_s25 = smov [#allocation14]   ;;  %s2105_s28 = smov [#allocation8]  }
  0x2c   : > { %p1830_p1 = pneg %p2229_p0  ;;  %s484_s26 = sshll.u32 %s2104_s25, 4  ;;  %s2235_s26 = int_to_ptr.vmem [resolvable:$true] %s484_s26 }
  0x2d   : > { %s436_s29 = sshll.u32 %s2105_s28, 4  ;;  %s2106_s30 = smov [#allocation13]   ;;  %s2243_s29 = int_to_ptr.vmem [resolvable:$true] %s436_s29 }
  0x2e   : > { %p2239_p2 = pnand %p1846_p13, %p1830_p1  ;;  %s2245_s0 = sshll.u32 %s2106_s30, 4  ;;  %s469_s0 = int_to_ptr.vmem [resolvable:$true] %s2245_s0 }
  0x2f   : > { %s1924_s2 = scalar_lea.vmem %s453_s24, 2048  ;;  %p1932_p7 = scmp.lt.s32.totalorder %s453_s24, %s453_s24 }
  0x30   : > { %p2249_p3 = pneg %p2239_p2  ;;  %p1925_p4 = scmp.ne.s32.totalorder %s453_s24, %s1924_s2 }
  0x31   : > { %p1933_p8 = scmp.lt.s32.totalorder %s1924_s2, %s1924_s2 }
  0x32   : > { %p1927_p5 = pnand %p1925_p4, %p2249_p3 }
  0x33   : > { %p1934_p9 = por %p1933_p8, %p1932_p7 }
  0x34   : > { %p1928_p6 = pneg %p1927_p5 }
  0x36   : > { %p1935_p10 = pnand %p1934_p9, %p1928_p6 }
  0x38   : > { %1938 = shalt.err (!%p1935_p10)
}
  0x39   : > { %s2107_s20 = smov 128   ;;  %s2108_s21 = smov 8  }
  0x3a   : > { %1836 = dma.hbm_to_vmem [thread:$0]  (!%p2239_p2), %s2437_s10, 2048, %s453_s24, [#allocation12], %s2107_s20, %s2107_s20, %s2108_s21  }
  0x3b   : > { %s1950_s25 = scalar_lea.vmem %s2235_s26, 2048  ;;  %p1958_p5 = scmp.lt.s32.totalorder %s2235_s26, %s2235_s26 }
  0x3c   : > { %p1951_p11 = scmp.ne.s32.totalorder %s2235_s26, %s1950_s25  ;;  %p1959_p6 = scmp.lt.s32.totalorder %s1950_s25, %s1950_s25 }
  0x3e   : > { %p1953_p1 = pnand %p1951_p11, %p2249_p3  ;;  %p1960_p7 = por %p1959_p6, %p1958_p5 }
  0x40   : > { %p1954_p4 = pneg %p1953_p1 }
  0x42   : > { %p1961_p8 = pnand %p1960_p7, %p1954_p4 }
  0x44   : > { %1964 = shalt.err (!%p1961_p8)
}
  0x45   : > { %1842 = dma.hbm_to_vmem [thread:$0]  (!%p2239_p2), %s2441_s14, 2048, %s2235_s26, [#allocation15], %s2107_s20, %s2107_s20, %s2108_s21  }
  0x46   : > { %s1976_s24 = scalar_lea.vmem %s2243_s29, 2048  ;;  %p1984_p1 = scmp.lt.s32.totalorder %s2243_s29, %s2243_s29 }
  0x47   : > { %p1977_p9 = scmp.ne.s32.totalorder %s2243_s29, %s1976_s24  ;;  %p1985_p4 = scmp.lt.s32.totalorder %s1976_s24, %s1976_s24 }
  0x49   : > { %p1979_p10 = pnand %p1977_p9, %p2249_p3  ;;  %p1986_p5 = por %p1985_p4, %p1984_p1 }
  0x4b   : > { %p1980_p11 = pneg %p1979_p10 }
  0x4d   : > { %p1987_p6 = pnand %p1986_p5, %p1980_p11 }
  0x4f   : > { %1990 = shalt.err (!%p1987_p6)
}
  0x50   : > { %1833 = dma.hbm_to_vmem [thread:$0]  (!%p2239_p2), %s2435_s8, 2048, %s2243_s29, [#allocation9], %s2107_s20, %s2107_s20, %s2108_s21  }
  0x51   : > { %s2002_s26 = scalar_lea.vmem %s469_s0, 2048  ;;  %p2010_p10 = scmp.lt.s32.totalorder %s469_s0, %s469_s0 }
  0x52   : > { %p2003_p7 = scmp.ne.s32.totalorder %s469_s0, %s2002_s26  ;;  %p2011_p11 = scmp.lt.s32.totalorder %s2002_s26, %s2002_s26 }
  0x54   : > { %p2005_p8 = pnand %p2003_p7, %p2249_p3  ;;  %p2012_p1 = por %p2011_p11, %p2010_p10 }
  0x56   : > { %p2006_p9 = pneg %p2005_p8 }
  0x58   : > { %p2013_p4 = pnand %p2012_p1, %p2006_p9 }
  0x5a   : > { %2016 = shalt.err (!%p2013_p4)
}
  0x5b   : > { %1839 = dma.hbm_to_vmem [thread:$0]  (!%p2239_p2), %s2439_s12, 2048, %s469_s0, [#allocation12], %s2107_s20, %s2107_s20, %s2108_s21  }
  0x5c   : > { %s2109_s29 = smov [#allocation16]  }
  0x5d   : > { %s500_s28 = sshll.u32 %s2109_s29, 4  ;;  %s501_s28 = int_to_ptr.vmem [resolvable:$true] %s500_s28 }
  0x5e   : > { %s2028_s30 = scalar_lea.vmem %s501_s28, 2048  ;;  %p2036_p8 = scmp.lt.s32.totalorder %s501_s28, %s501_s28 }
  0x5f   : > { %p2029_p5 = scmp.ne.s32.totalorder %s501_s28, %s2028_s30  ;;  %p2037_p9 = scmp.lt.s32.totalorder %s2028_s30, %s2028_s30 }
  0x61   : > { %p2031_p6 = pnand %p2029_p5, %p2249_p3  ;;  %p2038_p10 = por %p2037_p9, %p2036_p8 }
  0x63   : > { %p2032_p7 = pneg %p2031_p6 }
  0x65   : > { %p2039_p11 = pnand %p2038_p10, %p2032_p7 }
  0x67   : > { %2042 = shalt.err (!%p2039_p11)
}
  0x68   : > { %1845 = dma.hbm_to_vmem [thread:$0]  (!%p2239_p2), %s2443_s16, 2048, %s501_s28, [#allocation15], %s2107_s20, %s2107_s20, %s2108_s21  }
  0x69   : > { %526 = sbr.rel (%p2229_p0) target bundleno = 1778 (0x6f2), region = 84 }
  0x6e   : > { %2078 = dma.done.wait (%p1846_p13), [#allocation9], 2048  }
  0x6f   : > { %2080 = vsyncadd (%p1846_p13), [#allocation9], 4294965248 }
  0x70   : > { %2082 = dma.done.wait (%p1846_p13), [#allocation12], 4096  }
  0x71   : > { %2084 = vsyncadd (%p1846_p13), [#allocation12], 4294963200 }
  0x72   : > { %2086 = dma.done.wait (%p1846_p13), [#allocation15], 4096  }
  0x73   : > { %2088 = vsyncadd (%p1846_p13), [#allocation15], 4294963200  ;;  %p586_p0 = scmp.lt.s32.totalorder %s2223_s4, 2  ;;  %s2456_s21 = sld [smem:[#allocation25_spill]] }
  0x74   : > { %s2457_s29 = sld [smem:[#allocation24_spill]] (!%p1484_p12) }
  0x75   : > { %s587_s3 = scalar_select %p586_p0, %s2223_s4, 2 }
  0x76   : > { %593 = sbr.rel (%p1484_p12) target bundleno = 322 (0x142), region = 108 }
  0x77   : > { %s1496_s27 = sshll.u32 %s587_s3, 3 }
  0x79   : > { %s589_s2 = scalar_lea.vmem %s2456_s21, %s1496_s27 }
  0x7b   : > { %v596_v0 = vld [vmem:[%s2432_s5] sm:$0xf]  ;;  %vm604_vm0 = vcmask 1043456   ;;  %vm597_vm1 = vcmask 31744   ;;  %v595_v2 = vld [vmem:[%s2457_s29 + $0x8] sm:$0xff]  ;;  %v2110_v3 = vmov 0.0  }
  0x7c   : > { %v594_v1 = vld [vmem:[%s2457_s29] sm:$0xff]  ;;  %1614 = vmatprep.subr.msk.mxu0 %vm604_vm0, %v596_v0  ;;  %685 = vst [vmem:[#allocation3] sm:$0xff] %v2110_v3  ;;  %686 = vst [vmem:[#allocation3 + $0x8] sm:$0xff] %v2110_v3 }
  0x7d   : > { %1616 = vmatprep.mubr.msk.f32.mxu0 %vm597_vm1, %v594_v1  ;;  %1615 = vmatpush3.msk.msra.mxu0 %vm604_vm0, %v596_v0 }
  0x7e   : > { %1617 = vmatmul.mubr.msk.f32.vlgmr.msra.gmra.mxu0 %vm597_vm1, %v595_v2 }
 0x13e   : > { %v1618_v4 = vpop.f32.mrf.mxu0 }
 0x13f   : > { %684 = vst [vmem:[#allocation2 + $0x8] sm:$0xff] %v1618_v4 }
 0x140   : > { %v674_v5 = vpop.f32.mrf.mxu0 }
 0x141   : > { %683 = vst [vmem:[#allocation2] sm:$0xff] %v674_v5 }
 0x142 PF: > { %v688_v6 = vld [vmem:[%s2433_s6] sm:$0x7]  ;;  %vm700_vm2 = vcmask 1042432   ;;  %v2111_v8 = vmov 0.0   ;;  %vm2112_vm3 = vmmov 0   ;;  %vm696_vm4 = vcmask 23552  }
 0x143   : > { %v687_v7 = vld [vmem:[%s589_s2] sm:$0xff]  ;;  %1619 = vmatprep.subr.mxu0 %v2111_v8  ;;  %1621 = vmatprep.mubr.msk.f32.mxu0 %vm2112_vm3, %v2111_v8  ;;  %s1504_s3 = sshll.u32 %s2223_s4, 3  ;;  %s2097_s20 = smov 0  }
 0x144   : > { %1620 = vmatpush3.msk.msra.mxu0 %vm700_vm2, %v688_v6  ;;  %v1501_v9 = vld [vmem:[%s2434_s7] ss:$0 sm:$0xff] }
 0x145   : > { %1622 = vmatmul.mubr.msk.f32.vlgmr.msra.gmra.mxu0 %vm696_vm4, %v687_v7 }
 0x205   : > { %v770_v10 = vpop.f32.mrf.mxu0 }
 0x206   : > { %v771_v11 = vadd.f32 %v1501_v9, %v770_v10 }
 0x207   : > { %v1623_v12 = vpop.f32.mrf.mxu0 }
 0x208   : > { %774 = vst [vmem:[#allocation4] sm:$0xff] %v771_v11 }
 0x209 LB: >> { %s782_s21 = sadd.s32 %s2099_s20, %s1504_s3  ;;  %s790_s25 = scalar_lea.vmem [#allocation4], %s2099_s20  ;;  %s2099_s20 = sphi %s2097_s20, %s781_s20  }
 0x20a   : >> { %s783_s2 = sld [smem:[#allocation6 + %s782_s21]]  ;;  %p785_p12 = scmp.lt.s32.totalorder %s782_s21, 24 }
 0x20b   : >> { %s784_s22 = sld [smem:[#allocation7 + %s782_s21]]  ;;  %s781_s20 = sadd.s32 1, %s2099_s20  }
 0x20c   : >> { %s786_s26 = scalar_select %p785_p12, 1, 0 }
 0x20d   : >> { %p778_p13 = scmp.ge.s32.totalorder %s781_s20, 8  }
 0x20e   : >> { %s787_s23 = scvt.s32.f32 %s786_s26  ;;  %p1505_p2 = scmp.ne.s32.totalorder (%p778_p13), %s2223_s4, 2 }
 0x20f   : >> { %v791_v13 = vld [vmem:[%s790_s25] sm:$0x1] }
 0x210   : >> { %s788_s28 = scalar_lea.vmem [#allocation2], %s783_s2  ;;  %v796_v16 = vstv %s787_s23 }
 0x211   : >> { %v789_v14 = vld [vmem:[%s788_s28] sm:$0x1]  ;;  %s794_s30 = scalar_lea.vmem [#allocation3], %s784_s22 }
 0x212   : >> { %v792_v15 = vadd.f32 %v791_v13, %v789_v14  ;;  %v795_v18 = vld [vmem:[%s794_s30] sm:$0x1] }
 0x214   : >> { %v793_v17 = vmax.f32 %v792_v15, 0.0 }
 0x216   : >> { %v797_v19 = vmul.f32 %v796_v16, %v793_v17  ;;  %780 = sbr.rel (!%p778_p13) target bundleno = 521 (0x209), region = 150 }
 0x218   : >> { %v798_v20 = vadd.f32 %v797_v19, %v795_v18 }
 0x21a   : >> { %799 = vst [vmem:[%s794_s30] sm:$0x1] %v798_v20 }
 0x21b   : > { %803 = sbr.rel (%p1505_p2) target bundleno = 1763 (0x6e3), region = 119  ;;  %s2458_s22 = sld [smem:[#allocation26_spill]] (!%p1505_p2) }
 0x220   : > { %v821_v21 = vld [vmem:[#allocation8 + $0x78] sm:$0xff]  ;;  %v820_v22 = vld [vmem:[#allocation8 + $0x70] sm:$0xff]  ;;  %v819_v23 = vld [vmem:[#allocation8 + $0x68] sm:$0xff]  ;;  %vm2114_vm5 = vmmov 0   ;;  %vm1116_vm7 = vcmask 130048  }
 0x221   : > { %1624 = vmatprep.subr.mxu0 %v821_v21  ;;  %v818_v24 = vld [vmem:[#allocation8 + $0x60] sm:$0xff]  ;;  %v804_v25 = vld [vmem:[#allocation3] sm:$0xff]  ;;  %v817_v26 = vld [vmem:[#allocation8 + $0x58] sm:$0xff] }
 0x222   : > { %1625 = vmatpush3.msra.mxu0 %v821_v21  ;;  %1656 = vmatprep.mubr.f32.mxu0 %v804_v25  ;;  %v921_v27 = vld [vmem:[#allocation11 + $0x78] sm:$0xff]  ;;  %v920_v28 = vld [vmem:[#allocation11 + $0x70] sm:$0xff]  ;;  %v919_v30 = vld [vmem:[#allocation11 + $0x68] sm:$0xff]  ;;  %v2113_v21 = vmov 0.0  }
 0x223   : > { %1626 = vmatprep.subr.mxu0 %v820_v22  ;;  %1659 = vmatprep.subr.mxu1 %v921_v27  ;;  %v816_v29 = vld [vmem:[#allocation8 + $0x50] sm:$0xff]  ;;  %v815_v31 = vld [vmem:[#allocation8 + $0x48] sm:$0xff]  ;;  %v918_v32 = vld [vmem:[#allocation11 + $0x60] sm:$0xff] }
 0x224   : > { %1627 = vmatpush3.msra.mxu0 %v820_v22  ;;  %1660 = vmatpush3.msra.mxu1 %v921_v27  ;;  %v814_v33 = vld [vmem:[#allocation8 + $0x40] sm:$0xff]  ;;  %v917_v34 = vld [vmem:[#allocation11 + $0x58] sm:$0xff]  ;;  %v916_v36 = vld [vmem:[#allocation11 + $0x50] sm:$0xff]  ;;  %v1106_v22 = vlaneseq }
 0x225   : > { %1628 = vmatprep.subr.mxu0 %v819_v23  ;;  %1661 = vmatprep.subr.mxu1 %v920_v28  ;;  %v813_v35 = vld [vmem:[#allocation8 + $0x38] sm:$0xff]  ;;  %v812_v37 = vld [vmem:[#allocation8 + $0x30] sm:$0xff]  ;;  %v915_v38 = vld [vmem:[#allocation11 + $0x48] sm:$0xff] }
 0x226   : > { %1629 = vmatpush3.msra.mxu0 %v819_v23  ;;  %1662 = vmatpush3.msra.mxu1 %v920_v28  ;;  %v811_v39 = vld [vmem:[#allocation8 + $0x28] sm:$0xff]  ;;  %v914_v40 = vld [vmem:[#allocation11 + $0x40] sm:$0xff]  ;;  %v913_v42 = vld [vmem:[#allocation11 + $0x38] sm:$0xff] }
 0x227   : > { %1630 = vmatprep.subr.mxu0 %v818_v24  ;;  %1663 = vmatprep.subr.mxu1 %v919_v30  ;;  %v810_v41 = vld [vmem:[#allocation8 + $0x20] sm:$0xff]  ;;  %v809_v43 = vld [vmem:[#allocation8 + $0x18] sm:$0xff]  ;;  %v912_v44 = vld [vmem:[#allocation11 + $0x30] sm:$0xff] }
 0x228   : > { %1631 = vmatpush3.msra.mxu0 %v818_v24  ;;  %1664 = vmatpush3.msra.mxu1 %v919_v30  ;;  %v808_v45 = vld [vmem:[#allocation8 + $0x10] sm:$0xff]  ;;  %v911_v46 = vld [vmem:[#allocation11 + $0x28] sm:$0xff]  ;;  %v910_v48 = vld [vmem:[#allocation11 + $0x20] sm:$0xff]  ;;  %v1107_v24 = vshrl.u32 %v1106_v22, 7 }
 0x229   : > { %1632 = vmatprep.subr.mxu0 %v817_v26  ;;  %1665 = vmatprep.subr.mxu1 %v918_v32  ;;  %v807_v47 = vld [vmem:[#allocation8 + $0x8] sm:$0xff]  ;;  %v806_v49 = vld [vmem:[#allocation8] sm:$0xff]  ;;  %v805_v50 = vld [vmem:[#allocation3 + $0x8] sm:$0xff] }
 0x22a   : > { %1633 = vmatpush3.msra.mxu0 %v817_v26  ;;  %1666 = vmatpush3.msra.mxu1 %v918_v32  ;;  %v909_v51 = vld [vmem:[#allocation11 + $0x18] sm:$0xff]  ;;  %v908_v52 = vld [vmem:[#allocation11 + $0x10] sm:$0xff]  ;;  %v907_v53 = vld [vmem:[#allocation11 + $0x8] sm:$0xff] }
 0x22b   : > { %1634 = vmatprep.subr.mxu0 %v816_v29  ;;  %1667 = vmatprep.subr.mxu1 %v917_v34  ;;  %v906_v54 = vld [vmem:[#allocation11] sm:$0xff]  ;;  %v1021_v55 = vld [vmem:[#allocation13 + $0x78] sm:$0xff]  ;;  %v1020_v56 = vld [vmem:[#allocation13 + $0x70] sm:$0xff] }
 0x22c   : > { %1635 = vmatpush3.msra.mxu0 %v816_v29  ;;  %1668 = vmatpush3.msra.mxu1 %v917_v34  ;;  %v1019_v57 = vld [vmem:[#allocation13 + $0x68] sm:$0xff]  ;;  %v1018_v58 = vld [vmem:[#allocation13 + $0x60] sm:$0xff]  ;;  %v1017_v59 = vld [vmem:[#allocation13 + $0x58] sm:$0xff] }
 0x22d   : > { %1636 = vmatprep.subr.mxu0 %v815_v31  ;;  %1669 = vmatprep.subr.mxu1 %v916_v36  ;;  %v1016_v60 = vld [vmem:[#allocation13 + $0x50] sm:$0xff]  ;;  %v1015_v61 = vld [vmem:[#allocation13 + $0x48] sm:$0xff]  ;;  %v1014_v62 = vld [vmem:[#allocation13 + $0x40] sm:$0xff] }
 0x22e   : > { %1637 = vmatpush3.msra.mxu0 %v815_v31  ;;  %1670 = vmatpush3.msra.mxu1 %v916_v36  ;;  %v1013_v63 = vld [vmem:[#allocation13 + $0x38] sm:$0xff]  ;;  %v1012_v0 = vld [vmem:[#allocation13 + $0x30] sm:$0xff]  ;;  %v1011_v1 = vld [vmem:[#allocation13 + $0x28] sm:$0xff] }
 0x22f   : > { %1638 = vmatprep.subr.mxu0 %v814_v33  ;;  %1671 = vmatprep.subr.mxu1 %v915_v38  ;;  %v1010_v2 = vld [vmem:[#allocation13 + $0x20] sm:$0xff]  ;;  %v1506_v3 = vld [vmem:[%s2436_s9] ss:$0 sm:$0xff]  ;;  %v1008_v11 = vld [vmem:[#allocation13 + $0x10] sm:$0xff] }
 0x230   : > { %1639 = vmatpush3.msra.mxu0 %v814_v33  ;;  %1672 = vmatpush3.msra.mxu1 %v915_v38  ;;  %v1009_v10 = vld [vmem:[#allocation13 + $0x18] sm:$0xff]  ;;  %v1007_v12 = vld [vmem:[#allocation13 + $0x8] sm:$0xff]  ;;  %v1006_v13 = vld [vmem:[#allocation13] sm:$0xff] }
 0x231   : > { %1640 = vmatprep.subr.mxu0 %v813_v35  ;;  %1673 = vmatprep.subr.mxu1 %v914_v40  ;;  %v1507_v14 = vld [vmem:[%s2438_s11] ss:$0 sm:$0xff]  ;;  %v1204_v34 = vld [vmem:[#allocation14 + $0x70] sm:$0xff]  ;;  %v1202_v36 = vld [vmem:[#allocation14 + $0x60] sm:$0xff] }
 0x232   : > { %1641 = vmatpush3.msra.mxu0 %v813_v35  ;;  %1674 = vmatpush3.msra.mxu1 %v914_v40  ;;  %v1508_v23 = vld [vmem:[%s2440_s13] ss:$0 sm:$0xff]  ;;  %v1203_v35 = vld [vmem:[#allocation14 + $0x68] sm:$0xff]  ;;  %v1200_v38 = vld [vmem:[#allocation14 + $0x50] sm:$0xff] }
 0x233   : > { %1642 = vmatprep.subr.mxu0 %v812_v37  ;;  %1675 = vmatprep.subr.mxu1 %v913_v42  ;;  %v1509_v25 = vld [vmem:[%s2458_s22] ss:$0 sm:$0xff]  ;;  %v1198_v40 = vld [vmem:[#allocation14 + $0x40] sm:$0xff] }
 0x234   : > { %1643 = vmatpush3.msra.mxu0 %v812_v37  ;;  %1676 = vmatpush3.msra.mxu1 %v913_v42  ;;  %vm1113_vm6 = vcmp.eq.s32.totalorder %v1107_v24, %v1509_v25  ;;  %v1205_v33 = vld [vmem:[#allocation14 + $0x78] sm:$0xff]  ;;  %v1196_v42 = vld [vmem:[#allocation14 + $0x30] sm:$0xff] }
 0x235   : > { %1644 = vmatprep.subr.mxu0 %v811_v39  ;;  %1677 = vmatprep.subr.mxu1 %v912_v44  ;;  %v1510_v32 = vsel %vm1113_vm6, 1.0, %v2113_v21  ;;  %v1201_v37 = vld [vmem:[#allocation14 + $0x58] sm:$0xff] }
 0x236   : > { %1645 = vmatpush3.msra.mxu0 %v811_v39  ;;  %1678 = vmatpush3.msra.mxu1 %v912_v44  ;;  %v1199_v39 = vld [vmem:[#allocation14 + $0x48] sm:$0xff]  ;;  %v1194_v44 = vld [vmem:[#allocation14 + $0x20] sm:$0xff] }
 0x237   : > { %1646 = vmatprep.subr.mxu0 %v810_v41  ;;  %1679 = vmatprep.subr.mxu1 %v911_v46 }
 0x238   : > { %1647 = vmatpush3.msra.mxu0 %v810_v41  ;;  %1680 = vmatpush3.msra.mxu1 %v911_v46  ;;  %v1197_v41 = vld [vmem:[#allocation14 + $0x38] sm:$0xff]  ;;  %v1192_v46 = vld [vmem:[#allocation14 + $0x10] sm:$0xff] }
 0x239   : > { %1648 = vmatprep.subr.mxu0 %v809_v43  ;;  %1681 = vmatprep.subr.mxu1 %v910_v48 }
 0x23a   : > { %1649 = vmatpush3.msra.mxu0 %v809_v43  ;;  %1682 = vmatpush3.msra.mxu1 %v910_v48  ;;  %v1195_v43 = vld [vmem:[#allocation14 + $0x28] sm:$0xff]  ;;  %v1190_v48 = vld [vmem:[#allocation14] sm:$0xff] }
 0x23b   : > { %1650 = vmatprep.subr.mxu0 %v808_v45  ;;  %1683 = vmatprep.subr.mxu1 %v909_v51 }
 0x23c   : > { %1651 = vmatpush3.msra.mxu0 %v808_v45  ;;  %1684 = vmatpush3.msra.mxu1 %v909_v51  ;;  %v1193_v45 = vld [vmem:[#allocation14 + $0x18] sm:$0xff]  ;;  %v1297_v51 = vld [vmem:[#allocation16 + $0x68] sm:$0xff] }
 0x23d   : > { %1652 = vmatprep.subr.mxu0 %v807_v47  ;;  %1685 = vmatprep.subr.mxu1 %v908_v52 }
 0x23e   : > { %1653 = vmatpush3.msra.mxu0 %v807_v47  ;;  %1686 = vmatpush3.msra.mxu1 %v908_v52  ;;  %v1191_v47 = vld [vmem:[#allocation14 + $0x8] sm:$0xff]  ;;  %v1296_v52 = vld [vmem:[#allocation16 + $0x60] sm:$0xff] }
 0x23f   : > { %1654 = vmatprep.subr.mxu0 %v806_v49  ;;  %1687 = vmatprep.subr.mxu1 %v907_v53 }
 0x240   : > { %1655 = vmatpush3.msra.mxu0 %v806_v49  ;;  %1688 = vmatpush3.msra.mxu1 %v907_v53  ;;  %v1299_v49 = vld [vmem:[#allocation16 + $0x78] sm:$0xff] }
 0x241   : > { %1657 = vmatmul.mubr.f32.vlgmr.msra.gmra.mxu0 %v805_v50  ;;  %1689 = vmatprep.subr.mxu1 %v906_v54  ;;  %v1298_v50 = vld [vmem:[#allocation16 + $0x70] sm:$0xff]  ;;  %v1295_v53 = vld [vmem:[#allocation16 + $0x58] sm:$0xff] }
 0x242   : > { %1690 = vmatpush3.msra.mxu1 %v906_v54  ;;  %1694 = vmatprep.subr.mxu0 %v1021_v55  ;;  %v1294_v54 = vld [vmem:[#allocation16 + $0x50] sm:$0xff] }
 0x243   : > { %1695 = vmatpush3.msra.mxu0 %v1021_v55  ;;  %1729 = vmatprep.subr.mxu1 %v2113_v21  ;;  %v1293_v55 = vld [vmem:[#allocation16 + $0x48] sm:$0xff] }
 0x244   : > { %1696 = vmatprep.subr.mxu0 %v1020_v56 }
 0x245   : > { %1697 = vmatpush3.msra.mxu0 %v1020_v56  ;;  %v1292_v56 = vld [vmem:[#allocation16 + $0x40] sm:$0xff] }
 0x246   : > { %1698 = vmatprep.subr.mxu0 %v1019_v57 }
 0x247   : > { %1699 = vmatpush3.msra.mxu0 %v1019_v57  ;;  %v1291_v57 = vld [vmem:[#allocation16 + $0x38] sm:$0xff] }
 0x248   : > { %1700 = vmatprep.subr.mxu0 %v1018_v58 }
 0x249   : > { %1701 = vmatpush3.msra.mxu0 %v1018_v58  ;;  %v1290_v58 = vld [vmem:[#allocation16 + $0x30] sm:$0xff] }
 0x24a   : > { %1702 = vmatprep.subr.mxu0 %v1017_v59 }
 0x24b   : > { %1703 = vmatpush3.msra.mxu0 %v1017_v59  ;;  %v1289_v59 = vld [vmem:[#allocation16 + $0x28] sm:$0xff] }
 0x24c   : > { %1704 = vmatprep.subr.mxu0 %v1016_v60 }
 0x24d   : > { %1705 = vmatpush3.msra.mxu0 %v1016_v60  ;;  %v1288_v60 = vld [vmem:[#allocation16 + $0x20] sm:$0xff] }
 0x24e   : > { %1706 = vmatprep.subr.mxu0 %v1015_v61 }
 0x24f   : > { %1707 = vmatpush3.msra.mxu0 %v1015_v61  ;;  %v1287_v61 = vld [vmem:[#allocation16 + $0x18] sm:$0xff] }
 0x250   : > { %1708 = vmatprep.subr.mxu0 %v1014_v62 }
 0x251   : > { %1709 = vmatpush3.msra.mxu0 %v1014_v62 }
 0x252   : > { %1710 = vmatprep.subr.mxu0 %v1013_v63 }
 0x253   : > { %1711 = vmatpush3.msra.mxu0 %v1013_v63 }
 0x254   : > { %1712 = vmatprep.subr.mxu0 %v1012_v0 }
 0x255   : > { %1713 = vmatpush3.msra.mxu0 %v1012_v0  ;;  %v1286_v0 = vld [vmem:[#allocation16 + $0x10] sm:$0xff] }
 0x256   : > { %1714 = vmatprep.subr.mxu0 %v1011_v1 }
 0x257   : > { %1715 = vmatpush3.msra.mxu0 %v1011_v1  ;;  %v1285_v1 = vld [vmem:[#allocation16 + $0x8] sm:$0xff] }
 0x258   : > { %1716 = vmatprep.subr.mxu0 %v1010_v2 }
 0x259   : > { %1717 = vmatpush3.msra.mxu0 %v1010_v2  ;;  %v1284_v2 = vld [vmem:[#allocation16] sm:$0xff] }
 0x25a   : > { %1718 = vmatprep.subr.mxu0 %v1009_v10 }
 0x25b   : > { %1719 = vmatpush3.msra.mxu0 %v1009_v10 }
 0x25c   : > { %1720 = vmatprep.subr.mxu0 %v1008_v11 }
 0x25d   : > { %1721 = vmatpush3.msra.mxu0 %v1008_v11 }
 0x25e   : > { %1722 = vmatprep.subr.mxu0 %v1007_v12 }
 0x25f   : > { %1723 = vmatpush3.msra.mxu0 %v1007_v12 }
 0x260   : > { %1724 = vmatprep.subr.mxu0 %v1006_v13 }
 0x261   : > { %1725 = vmatpush3.msra.mxu0 %v1006_v13 }
 0x262   : > { %1771 = vmatprep.subr.mxu0 %v2113_v21 }
 0x301   : > { %v1658_v4 = vpop.f32.mrf.mxu0 }
 0x302   : > { %v901_v5 = vadd.f32 %v1658_v4, %v1506_v3 }
 0x303   : > { %v895_v6 = vpop.f32.mrf.mxu0 }
 0x304   : > { %v896_v7 = vadd.f32 %v1506_v3, %v895_v6  ;;  %v905_v9 = vmax.f32 %v901_v5, 0.0  ;;  %v1512_v3 = vld [vmem:[%s2442_s15] ss:$0 sm:$0xff] }
 0x306   : > { %v904_v8 = vmax.f32 %v896_v7, 0.0 }
 0x308   : > { %1691 = vmatprep.mubr.f32.mxu1 %v904_v8  ;;  %v1513_v8 = vld [vmem:[%s2444_s17] ss:$0 sm:$0xff] }
 0x309   : > { %1692 = vmatmul.mubr.f32.vlgmr.msra.gmra.mxu1 %v905_v9 }
 0x30a   : > { %1733 = vmatprep.mubr.msk.f32.mxu1 %vm2114_vm5, %v2113_v21 }
 0x3c9   : > { %v1693_v15 = vpop.f32.mrf.mxu1 }
 0x3ca   : > { %v1001_v16 = vadd.f32 %v1693_v15, %v1507_v14 }
 0x3cb   : > { %v995_v17 = vpop.f32.mrf.mxu1 }
 0x3cc   : > { %v996_v18 = vadd.f32 %v1507_v14, %v995_v17  ;;  %v1005_v20 = vmax.f32 %v1001_v16, 0.0 }
 0x3ce   : > { %v1004_v19 = vmax.f32 %v996_v18, 0.0 }
 0x3d0   : > { %1726 = vmatprep.mubr.f32.mxu0 %v1004_v19 }
 0x3d1   : > { %1727 = vmatmul.mubr.f32.vlgmr.msra.gmra.mxu0 %v1005_v20 }
 0x3d2   : > { %1803 = vmatprep.mubr.msk.f32.mxu0 %vm2114_vm5, %v2113_v21  ;;  %1772 = vmatpush3.msra.mxu0 %v1299_v49 }
 0x3d3   : > { %1773 = vmatprep.subr.mxu0 %v2113_v21 }
 0x3d4   : > { %1774 = vmatpush3.msra.mxu0 %v1298_v50 }
 0x3d5   : > { %1775 = vmatprep.subr.mxu0 %v2113_v21 }
 0x3d6   : > { %1776 = vmatpush3.msra.mxu0 %v1297_v51 }
 0x3d7   : > { %1777 = vmatprep.subr.mxu0 %v2113_v21 }
 0x3d8   : > { %1778 = vmatpush3.msra.mxu0 %v1296_v52 }
 0x3d9   : > { %1779 = vmatprep.subr.mxu0 %v2113_v21 }
 0x3da   : > { %1780 = vmatpush3.msra.mxu0 %v1295_v53 }
 0x3db   : > { %1781 = vmatprep.subr.mxu0 %v2113_v21 }
 0x3dc   : > { %1782 = vmatpush3.msra.mxu0 %v1294_v54 }
 0x3dd   : > { %1783 = vmatprep.subr.mxu0 %v2113_v21 }
 0x3de   : > { %1784 = vmatpush3.msra.mxu0 %v1293_v55 }
 0x3df   : > { %1785 = vmatprep.subr.mxu0 %v2113_v21 }
 0x3e0   : > { %1786 = vmatpush3.msra.mxu0 %v1292_v56 }
 0x3e1   : > { %1787 = vmatprep.subr.mxu0 %v2113_v21 }
 0x3e2   : > { %1788 = vmatpush3.msra.mxu0 %v1291_v57 }
 0x3e3   : > { %1789 = vmatprep.subr.mxu0 %v2113_v21 }
 0x3e4   : > { %1790 = vmatpush3.msra.mxu0 %v1290_v58 }
 0x3e5   : > { %1791 = vmatprep.subr.mxu0 %v2113_v21 }
 0x3e6   : > { %1792 = vmatpush3.msra.mxu0 %v1289_v59 }
 0x3e7   : > { %1793 = vmatprep.subr.mxu0 %v2113_v21 }
 0x3e8   : > { %1794 = vmatpush3.msra.mxu0 %v1288_v60 }
 0x3e9   : > { %1795 = vmatprep.subr.mxu0 %v2113_v21 }
 0x3ea   : > { %1796 = vmatpush3.msra.mxu0 %v1287_v61 }
 0x3eb   : > { %1797 = vmatprep.subr.mxu0 %v2113_v21 }
 0x3ec   : > { %1798 = vmatpush3.msra.mxu0 %v1286_v0 }
 0x3ed   : > { %1799 = vmatprep.subr.mxu0 %v2113_v21 }
 0x3ee   : > { %1800 = vmatpush3.msra.mxu0 %v1285_v1 }
 0x3ef   : > { %1801 = vmatprep.subr.mxu0 %v2113_v21 }
 0x3f0   : > { %1802 = vmatpush3.msra.mxu0 %v1284_v2 }
 0x491   : > { %v1728_v26 = vpop.f32.mrf.mxu0 }
 0x492   : > { %v1101_v27 = vadd.f32 %v1728_v26, %v1508_v23 }
 0x493   : > { %v1095_v28 = vpop.f32.mrf.mxu0 }
 0x494   : > { %v1105_v29 = vmax.f32 %v1101_v27, 0.0  ;;  %v1096_v30 = vadd.f32 %v1508_v23, %v1095_v28 }
 0x496   : > { %v1104_v31 = vmax.f32 %v1096_v30, 0.0  ;;  %1730 = vmatpush3.msra.mxu1 %v1105_v29 }
 0x497   : > { %1731 = vmatprep.subr.mxu1 %v2113_v21 }
 0x498   : > { %1732 = vmatpush3.msra.mxu1 %v1104_v31 }
 0x499   : > { %1734 = vmatmul.mubr.msk.f32.vlgmr.msra.gmra.mxu1 %vm1116_vm7, %v1510_v32  ;;  %1736 = vmatprep.subr.mxu1 %v2113_v21 }
 0x49a   : > { %1737 = vmatpush3.msra.mxu1 %v1205_v33  ;;  %1768 = vmatprep.mubr.msk.f32.mxu1 %vm2114_vm5, %v2113_v21 }
 0x49b   : > { %1738 = vmatprep.subr.mxu1 %v2113_v21 }
 0x49c   : > { %1739 = vmatpush3.msra.mxu1 %v1204_v34 }
 0x49d   : > { %1740 = vmatprep.subr.mxu1 %v2113_v21 }
 0x49e   : > { %1741 = vmatpush3.msra.mxu1 %v1203_v35 }
 0x49f   : > { %1742 = vmatprep.subr.mxu1 %v2113_v21 }
 0x4a0   : > { %1743 = vmatpush3.msra.mxu1 %v1202_v36 }
 0x4a1   : > { %1744 = vmatprep.subr.mxu1 %v2113_v21 }
 0x4a2   : > { %1745 = vmatpush3.msra.mxu1 %v1201_v37 }
 0x4a3   : > { %1746 = vmatprep.subr.mxu1 %v2113_v21 }
 0x4a4   : > { %1747 = vmatpush3.msra.mxu1 %v1200_v38 }
 0x4a5   : > { %1748 = vmatprep.subr.mxu1 %v2113_v21 }
 0x4a6   : > { %1749 = vmatpush3.msra.mxu1 %v1199_v39 }
 0x4a7   : > { %1750 = vmatprep.subr.mxu1 %v2113_v21 }
 0x4a8   : > { %1751 = vmatpush3.msra.mxu1 %v1198_v40 }
 0x4a9   : > { %1752 = vmatprep.subr.mxu1 %v2113_v21 }
 0x4aa   : > { %1753 = vmatpush3.msra.mxu1 %v1197_v41 }
 0x4ab   : > { %1754 = vmatprep.subr.mxu1 %v2113_v21 }
 0x4ac   : > { %1755 = vmatpush3.msra.mxu1 %v1196_v42 }
 0x4ad   : > { %1756 = vmatprep.subr.mxu1 %v2113_v21 }
 0x4ae   : > { %1757 = vmatpush3.msra.mxu1 %v1195_v43 }
 0x4af   : > { %1758 = vmatprep.subr.mxu1 %v2113_v21 }
 0x4b0   : > { %1759 = vmatpush3.msra.mxu1 %v1194_v44 }
 0x4b1   : > { %1760 = vmatprep.subr.mxu1 %v2113_v21 }
 0x4b2   : > { %1761 = vmatpush3.msra.mxu1 %v1193_v45 }
 0x4b3   : > { %1762 = vmatprep.subr.mxu1 %v2113_v21 }
 0x4b4   : > { %1763 = vmatpush3.msra.mxu1 %v1192_v46 }
 0x4b5   : > { %1764 = vmatprep.subr.mxu1 %v2113_v21 }
 0x4b6   : > { %1765 = vmatpush3.msra.mxu1 %v1191_v47 }
 0x4b7   : > { %1766 = vmatprep.subr.mxu1 %v2113_v21 }
 0x4b8   : > { %1767 = vmatpush3.msra.mxu1 %v1190_v48 }
 0x559   : > { %v1186_v62 = vpop.f32.mrf.mxu1 }
 0x55a   : > { %1769 = vmatmul.mubr.f32.vlgmr.msra.gmra.mxu1 %v1186_v62 }
 0x55b   : > { %v1735_v63 = vpop.f32.mrf.mxu1 }
 0x61a   : > { %v1279_v4 = vpop.f32.mrf.mxu1 }
 0x61b   : > { %v1280_v5 = vadd.f32 %v1512_v3, %v1279_v4 }
 0x61c   : > { %v1770_v6 = vpop.f32.mrf.mxu1 }
 0x61d   : > { %v1283_v7 = vmax.f32 %v1280_v5, 0.0 }
 0x61f   : > { %1804 = vmatmul.mubr.f32.vlgmr.msra.gmra.mxu0 %v1283_v7 }
 0x6df   : > { %v1373_v9 = vpop.f32.mrf.mxu0 }
 0x6e0   : > { %v1374_v10 = vadd.f32 %v1513_v8, %v1373_v9 }
 0x6e1   : > { %v1805_v11 = vpop.f32.mrf.mxu0 }
 0x6e2   : > { %1377 = vst [vmem:[#allocation17] sm:$0xff] %v1374_v10 }
 0x6e3 PF: > { %p1856_p3 = scmp.eq.s32.totalorder %s2223_s4, 2  ;;  %s2115_s30 = smov [#allocation17]  }
 0x6e4   : > { %s1385_s24 = sshll.u32 %s2115_s30, 4  ;;  %s1386_s24 = int_to_ptr.vmem [resolvable:$true] %s1385_s24 }
 0x6e5   : > { %s2043_s0 = scalar_lea.vmem %s1386_s24, 128  ;;  %p2050_p6 = scmp.lt.s32.totalorder %s1386_s24, %s1386_s24 }
 0x6e6   : > { %p2044_p1 = scmp.ne.s32.totalorder %s1386_s24, %s2043_s0  ;;  %p2051_p7 = scmp.lt.s32.totalorder %s2043_s0, %s2043_s0 }
 0x6e8   : > { %p2045_p4 = pnand %p2044_p1, %p1856_p3  ;;  %p2052_p8 = por %p2051_p7, %p2050_p6 }
 0x6ea   : > { %p2046_p5 = pneg %p2045_p4 }
 0x6ec   : > { %p2053_p9 = pnand %p2052_p8, %p2046_p5 }
 0x6ee   : > { %2056 = shalt.err (!%p2053_p9)
}
 0x6ef   : > { %1827 = dma.vmem_to_hbm [thread:$0]  (%p1856_p3), %s1386_s24, 128, %s2445_s18, [#allocation10]  }
 0x6f0   : > { %2090 = dma.done.wait (%p1856_p3), [#allocation10], 128  }
 0x6f1   : > { %2092 = vsyncadd (%p1856_p3), [#allocation10], 4294967168 }
 0x6f2 PF: > { %s42_s1 = sadd.s32 1, %s2095_s1  }
 0x6f3   : > { %p39_p10 = scmp.ge.s32.totalorder %s42_s1, 5  }
 0x6f5   :  { %41 = sbr.rel (!%p39_p10) target bundleno = 39 (0x27), region = 161 }
 0x6fa   :  { %1398 = vsyncpa [#allocation9], 1 }
 0x6fb   :  { %1400 = vsyncpa [#allocation9 + $0x1], 1 }
 0x6fc   :  { %1401 = vsyncpa [#allocation12], 1 }
 0x6fd   :  { %1402 = vsyncpa [#allocation15], 1 }
 0x6fe   :  { %1403 = vsyncpa [#allocation10], 1 }
 0x6ff   :  { %1405 = vsyncpa [#allocation10 + $0x1], 1 }

</bundles_post_ra>
